<compile_context>
chip_gen: v7x
topology: tpu7x:2x2x1
jax: 0.10.0
libtpu: 0.0.40
codegen_flags: <defaults>
</compile_context>

<pallas_src>
import jax
import jax.numpy as jnp
from jax.experimental import pallas as pl
from jax.experimental.pallas import tpu as pltpu


# ----------------------------- Pallas kernel -------------------------------

def _siamese_fwd_kernel(x1_ref, x2_ref, w_ref, b_ref, o1_ref, o2_ref):
    # x1_ref / x2_ref: (B, H*W)  flattened inputs (avg-pool folded into weight)
    # w_ref:           (H*W, S)  fc weight, row-replicated W times and scaled by 1/W
    # b_ref:           (1, S)    fc bias
    # o1_ref / o2_ref: (B, S)    branch outputs
    w = w_ref[...]
    b = b_ref[...]
    y1 = jnp.dot(x1_ref[...], w, preferred_element_type=jnp.float32) + b
    y2 = jnp.dot(x2_ref[...], w, preferred_element_type=jnp.float32) + b
    o1_ref[...] = jnp.maximum(y1, 0.0).astype(o1_ref.dtype)
    o2_ref[...] = jnp.maximum(y2, 0.0).astype(o2_ref.dtype)


def siamese_sv_forward(params, x1, x2):
    """Fused forward of SIAMESE_SV: returns (out1, out2)."""
    B, H, W = x1.shape
    assert x2.shape == (B, H, W)
    w_pool = params["fc_w_pooled"]          # (H*W, S), replicated & 1/W-scaled
    b = params["fc_b"]                      # (1, S), float32
    K, S = w_pool.shape
    assert K == H * W

    # Contiguous reshape -> metadata-only in XLA; avg-pool is folded into w_pool.
    x1f = x1.reshape(B, K)
    x2f = x2.reshape(B, K)

    out1, out2 = pl.pallas_call(
        _siamese_fwd_kernel,
        out_shape=(jax.ShapeDtypeStruct((B, S), jnp.float32),
                   jax.ShapeDtypeStruct((B, S), jnp.float32)),
        grid=(1,),
        in_specs=[
            pl.BlockSpec((B, K), lambda i: (0, 0)),
            pl.BlockSpec((B, K), lambda i: (0, 0)),
            pl.BlockSpec((K, S), lambda i: (0, 0)),
            pl.BlockSpec((1, S), lambda i: (0, 0)),
        ],
        out_specs=(
            pl.BlockSpec((B, S), lambda i: (0, 0)),
            pl.BlockSpec((B, S), lambda i: (0, 0)),
        ),
        compiler_params=pltpu.CompilerParams(
            dimension_semantics=("arbitrary",)),
    )(x1f, x2f, w_pool, b)

    return out1, out2


# ------------------------------ pure-JAX ref -------------------------------

def reference_forward(params, x1, x2):
    def once(x):
        pooled = jnp.mean(x, axis=-1)       # AvgPool1d(kernel=width) + view(-1, height)
        y = jnp.dot(pooled, params["fc_w"],
                    precision=jax.lax.Precision.HIGHEST) + params["fc_b"]
        return jax.nn.relu(y)
    return once(x1), once(x2)


# -------------------------------- params -----------------------------------

def init_params(key, height, width, speakers_num):
    k_w, k_b = jax.random.split(key)
    fc_w = 0.05 * jax.random.normal(k_w, (height, speakers_num), jnp.float32)
    fc_b = 0.05 * jax.random.normal(k_b, (1, speakers_num), jnp.float32)
    # Fold AvgPool1d(kernel=width) into the fc weight once at init:
    # row h*W + w of the replicated matrix is fc_w[h, :] / W, so
    # x.reshape(B, H*W) @ fc_w_pooled == mean_w(x) @ fc_w.
    fc_w_pooled = jnp.repeat(fc_w / width, width, axis=0)   # (H*W, S)
    return {
        "fc_w": fc_w,                # (H, S) for the pure-JAX reference
        "fc_b": fc_b,                # (1, S) float32 -- no per-call reshape/cast
        "fc_w_pooled": fc_w_pooled,  # (H*W, S) pool-folded kernel weight
    }


# ---------------------------------- main -----------------------------------

if __name__ == "__main__":
    key = jax.random.PRNGKey(0)
    k_param, k_x1, k_x2 = jax.random.split(key, 3)

    # Small shapes consistent with the module:
    #   _height = 32 feature rows, _width = 16 frames (= AvgPool1d kernel),
    #   speakers_num = 128 (lane-dense output), batch = 8 (f32 sublane-aligned).
    B, HEIGHT, WIDTH, SPEAKERS = 8, 32, 16, 128

    params = init_params(k_param, HEIGHT, WIDTH, SPEAKERS)
    x1 = jax.random.normal(k_x1, (B, HEIGHT, WIDTH), jnp.float32)
    x2 = jax.random.normal(k_x2, (B, HEIGHT, WIDTH), jnp.float32)

    out1, out2 = siamese_sv_forward(params, x1, x2)
    out1 = jax.block_until_ready(out1)
    out2 = jax.block_until_ready(out2)
    assert out1.shape == (B, SPEAKERS) and out1.dtype == jnp.float32
    assert out2.shape == (B, SPEAKERS) and out2.dtype == jnp.float32

    ref1, ref2 = reference_forward(params, x1, x2)
    ref1 = jax.block_until_ready(ref1)
    ref2 = jax.block_until_ready(ref2)

    assert bool(jnp.allclose(out1, ref1, atol=1e-3, rtol=1e-3)), (
        "branch-1 mismatch vs pure-JAX reference: "
        f"max abs diff = {float(jnp.max(jnp.abs(out1 - ref1)))}")
    assert bool(jnp.allclose(out2, ref2, atol=1e-3, rtol=1e-3)), (
        "branch-2 mismatch vs pure-JAX reference: "
        f"max abs diff = {float(jnp.max(jnp.abs(out2 - ref2)))}")

    print("KERNEL_OK")
</pallas_src>

<mosaic_0001>
module attributes {stable_mosaic.version = 11 : i64} {
  func.func @_siamese_fwd_kernel(%arg0: i32, %arg1: memref<8x512xf32, #tpu.memory_space<vmem>>, %arg2: memref<8x512xf32, #tpu.memory_space<vmem>>, %arg3: memref<512x128xf32, #tpu.memory_space<vmem>>, %arg4: memref<1x128xf32, #tpu.memory_space<vmem>>, %arg5: memref<8x128xf32, #tpu.memory_space<vmem>>, %arg6: memref<8x128xf32, #tpu.memory_space<vmem>>) attributes {dimension_semantics = [#tpu.dimension_semantics<arbitrary>], iteration_bounds = array<i64: 1>, scalar_prefetch = 0 : i64, scratch_operands = 0 : i64, tpu.core_type = #tpu.core_type<tc>, window_params = [{pipeline_mode = #tpu.pipeline_mode<synchronous>, transform_indices = @transform_0, window_bounds = array<i64: 8, 512>}, {pipeline_mode = #tpu.pipeline_mode<synchronous>, transform_indices = @transform_1, window_bounds = array<i64: 8, 512>}, {pipeline_mode = #tpu.pipeline_mode<synchronous>, transform_indices = @transform_2, window_bounds = array<i64: 512, 128>}, {pipeline_mode = #tpu.pipeline_mode<synchronous>, transform_indices = @transform_3, window_bounds = array<i64: 1, 128>}, {pipeline_mode = #tpu.pipeline_mode<synchronous>, transform_indices = @transform_4, window_bounds = array<i64: 8, 128>}, {pipeline_mode = #tpu.pipeline_mode<synchronous>, transform_indices = @transform_5, window_bounds = array<i64: 8, 128>}]} {
    %c0 = arith.constant 0 : index
    %c0_0 = arith.constant 0 : index
    %0 = vector.load %arg3[%c0, %c0_0] : memref<512x128xf32, #tpu.memory_space<vmem>>, vector<512x128xf32>
    %c0_1 = arith.constant 0 : index
    %c0_2 = arith.constant 0 : index
    %1 = vector.load %arg4[%c0_1, %c0_2] : memref<1x128xf32, #tpu.memory_space<vmem>>, vector<1x128xf32>
    %c0_3 = arith.constant 0 : index
    %c0_4 = arith.constant 0 : index
    %2 = vector.load %arg1[%c0_3, %c0_4] : memref<8x512xf32, #tpu.memory_space<vmem>>, vector<8x512xf32>
    %cst = arith.constant dense<0.000000e+00> : vector<8x128xf32>
    %3 = tpu.matmul %2, %0, %cst {dimension_numbers = #tpu.dot_dimension_numbers<[1], [0], [0], [1], [0, 0, 1, 1], [], []>} : vector<8x512xf32>, vector<512x128xf32>, vector<8x128xf32> -> vector<8x128xf32>
    %4 = vector.broadcast %1 : vector<1x128xf32> to vector<8x128xf32>
    %5 = arith.addf %3, %4 : vector<8x128xf32>
    %c0_5 = arith.constant 0 : index
    %c0_6 = arith.constant 0 : index
    %6 = vector.load %arg2[%c0_5, %c0_6] : memref<8x512xf32, #tpu.memory_space<vmem>>, vector<8x512xf32>
    %cst_7 = arith.constant dense<0.000000e+00> : vector<8x128xf32>
    %7 = tpu.matmul %6, %0, %cst_7 {dimension_numbers = #tpu.dot_dimension_numbers<[1], [0], [0], [1], [0, 0, 1, 1], [], []>} : vector<8x512xf32>, vector<512x128xf32>, vector<8x128xf32> -> vector<8x128xf32>
    %8 = vector.broadcast %1 : vector<1x128xf32> to vector<8x128xf32>
    %9 = arith.addf %7, %8 : vector<8x128xf32>
    %cst_8 = arith.constant 0.000000e+00 : f32
    %10 = vector.broadcast %cst_8 : f32 to vector<8x128xf32>
    %11 = arith.maximumf %5, %10 : vector<8x128xf32>
    %c0_9 = arith.constant 0 : index
    %c0_10 = arith.constant 0 : index
    %12 = vector.load %arg5[%c0_9, %c0_10] : memref<8x128xf32, #tpu.memory_space<vmem>>, vector<8x128xf32>
    tpu.vector_store %arg5[%c0_9, %c0_10], %11 {strides = array<i32>} : memref<8x128xf32, #tpu.memory_space<vmem>>, vector<8x128xf32>,
    %cst_11 = arith.constant 0.000000e+00 : f32
    %13 = vector.broadcast %cst_11 : f32 to vector<8x128xf32>
    %14 = arith.maximumf %9, %13 : vector<8x128xf32>
    %c0_12 = arith.constant 0 : index
    %c0_13 = arith.constant 0 : index
    %15 = vector.load %arg6[%c0_12, %c0_13] : memref<8x128xf32, #tpu.memory_space<vmem>>, vector<8x128xf32>
    tpu.vector_store %arg6[%c0_12, %c0_13], %14 {strides = array<i32>} : memref<8x128xf32, #tpu.memory_space<vmem>>, vector<8x128xf32>,
    return
  }
  func.func @transform_0(%arg0: i32) -> (i32, i32) {
    %c0_i32 = arith.constant 0 : i32
    %c0_i32_0 = arith.constant 0 : i32
    %c0_i32_1 = arith.constant 0 : i32
    return %c0_i32, %c0_i32_0 : i32, i32
  }
  func.func @transform_1(%arg0: i32) -> (i32, i32) {
    %c0_i32 = arith.constant 0 : i32
    %c0_i32_0 = arith.constant 0 : i32
    %c0_i32_1 = arith.constant 0 : i32
    return %c0_i32, %c0_i32_0 : i32, i32
  }
  func.func @transform_2(%arg0: i32) -> (i32, i32) {
    %c0_i32 = arith.constant 0 : i32
    %c0_i32_0 = arith.constant 0 : i32
    %c0_i32_1 = arith.constant 0 : i32
    return %c0_i32, %c0_i32_0 : i32, i32
  }
  func.func @transform_3(%arg0: i32) -> (i32, i32) {
    %c0_i32 = arith.constant 0 : i32
    %c0_i32_0 = arith.constant 0 : i32
    %c0_i32_1 = arith.constant 0 : i32
    return %c0_i32, %c0_i32_0 : i32, i32
  }
  func.func @transform_4(%arg0: i32) -> (i32, i32) {
    %c0_i32 = arith.constant 0 : i32
    %c0_i32_0 = arith.constant 0 : i32
    %c0_i32_1 = arith.constant 0 : i32
    return %c0_i32, %c0_i32_0 : i32, i32
  }
  func.func @transform_5(%arg0: i32) -> (i32, i32) {
    %c0_i32 = arith.constant 0 : i32
    %c0_i32_0 = arith.constant 0 : i32
    %c0_i32_1 = arith.constant 0 : i32
    return %c0_i32, %c0_i32_0 : i32, i32
  }
}

</mosaic_0001>

<bundles_post_ra>
// kernel: tpu_custom_call.1
= control target key start
LH: loop header
LB: loop body
LE: loop exit
PB: predicated region body
PF: predicated region fallthrough
CT: control target
= control target key end

     0   :  { %11 = vsyncpa [#allocation3], 0  ;;  %s1045_s0 = inlined_call_operand.hbm [shape: f32[8,512], index: 0, kind: input, shape index: {}]   ;;  %s1046_s1 = inlined_call_operand.hbm [shape: f32[8,512], index: 1, kind: input, shape index: {}]   ;;  %s1047_s2 = inlined_call_operand.hbm [shape: f32[512,128], index: 2, kind: input, shape index: {}]   ;;  %s1048_s3 = inlined_call_operand.vmem [shape: f32[1,128], index: 3, kind: input, shape index: {}]   ;;  %s1049_s4 = inlined_call_operand.hbm [shape: f32[8,128], index: 4, kind: output, shape index: {0}]   ;;  %s1050_s5 = inlined_call_operand.hbm [shape: f32[8,128], index: 5, kind: output, shape index: {1}]  }
   0x1   :  { %12 = vsyncpa [#allocation6], 0 }
   0x2   :  { %13 = vsyncpa [#allocation4], 0 }
   0x3   :  { %14 = vsyncpa [#allocation10], 0  ;;  %s845_s18 = smov [#allocation5]   ;;  %s846_s20 = smov [#allocation2]  }
   0x4   :  { %s31_s19 = sshll.u32 %s845_s18, 4  ;;  %s21_s21 = sshll.u32 %s846_s20, 4  ;;  %s32_s19 = int_to_ptr.vmem [resolvable:$true] %s31_s19  ;;  %s22_s21 = int_to_ptr.vmem [resolvable:$true] %s21_s21 }
   0x5   :  { %s727_s24 = scalar_lea.hbm %s1046_s1, 512 }
   0x6   :  { %p728_p0 = scmp.ne.s32.totalorder %s1046_s1, %s727_s24  ;;  %p731_p1 = scmp.lt.u32.totalorder %s727_s24, %s1046_s1 }
   0x8   :  { %p733_p2 = pnand %p731_p1, %p728_p0 }
   0xa   :  { %736 = shalt.err (!%p733_p2)
}
   0xb   :  { %s737_s29 = scalar_lea.vmem %s32_s19, 512  ;;  %p742_p4 = scmp.lt.s32.totalorder %s32_s19, %s32_s19 }
   0xc   :  { %p738_p3 = scmp.ne.s32.totalorder %s32_s19, %s737_s29  ;;  %p743_p5 = scmp.lt.s32.totalorder %s737_s29, %s737_s29 }
   0xe   :  { %p744_p6 = por %p743_p5, %p742_p4 }
  0x10   :  { %p745_p7 = pnand %p744_p6, %p738_p3 }
  0x12   :  { %748 = shalt.err (!%p745_p7)
}
  0x13   :  { %34 = dma.hbm_to_vmem [thread:$0]  %s1046_s1, 512, %s32_s19, [#allocation6]  }
  0x14   :  { %s749_s9 = scalar_lea.hbm %s1045_s0, 512 }
  0x15   :  { %p750_p8 = scmp.ne.s32.totalorder %s1045_s0, %s749_s9  ;;  %p753_p9 = scmp.lt.u32.totalorder %s749_s9, %s1045_s0 }
  0x17   :  { %p755_p10 = pnand %p753_p9, %p750_p8 }
  0x19   :  { %758 = shalt.err (!%p755_p10)
}
  0x1a   :  { %s759_s14 = scalar_lea.vmem %s22_s21, 512  ;;  %p764_p12 = scmp.lt.s32.totalorder %s22_s21, %s22_s21 }
  0x1b   :  { %p760_p11 = scmp.ne.s32.totalorder %s22_s21, %s759_s14  ;;  %p765_p13 = scmp.lt.s32.totalorder %s759_s14, %s759_s14 }
  0x1d   :  { %p766_p0 = por %p765_p13, %p764_p12 }
  0x1f   :  { %p767_p1 = pnand %p766_p0, %p760_p11 }
  0x21   :  { %770 = shalt.err (!%p767_p1)
}
  0x22   :  { %24 = dma.hbm_to_vmem [thread:$0]  %s1045_s0, 512, %s22_s21, [#allocation3]  }
  0x23   :  { %s847_s16 = smov [#allocation7]   ;;  %s771_s20 = scalar_lea.hbm %s1047_s2, 8192 }
  0x24   :  { %s40_s17 = sshll.u32 %s847_s16, 4  ;;  %p772_p2 = scmp.ne.s32.totalorder %s1047_s2, %s771_s20  ;;  %s41_s17 = int_to_ptr.vmem [resolvable:$true] %s40_s17 }
  0x25   :  { %p775_p3 = scmp.lt.u32.totalorder %s771_s20, %s1047_s2 }
  0x27   :  { %p777_p4 = pnand %p775_p3, %p772_p2 }
  0x29   :  { %780 = shalt.err (!%p777_p4)
}
  0x2a   :  { %s781_s26 = scalar_lea.vmem %s41_s17, 8192  ;;  %p786_p6 = scmp.lt.s32.totalorder %s41_s17, %s41_s17 }
  0x2b   :  { %p782_p5 = scmp.ne.s32.totalorder %s41_s17, %s781_s26  ;;  %p787_p7 = scmp.lt.s32.totalorder %s781_s26, %s781_s26 }
  0x2d   :  { %p788_p8 = por %p787_p7, %p786_p6 }
  0x2f   :  { %p789_p9 = pnand %p788_p8, %p782_p5 }
  0x31   :  { %792 = shalt.err (!%p789_p9)
}
  0x32   :  { %s848_s0 = smov 128   ;;  %s849_s21 = smov 8  }
  0x33   :  { %46 = dma.hbm_to_vmem [thread:$0]  %s1047_s2, 8192, %s41_s17, [#allocation6], %s848_s0, %s848_s0, %s849_s21  }
  0x34   :  { %837 = dma.done.wait [#allocation3], 512  }
  0x35   :  { %838 = vsyncadd [#allocation3], 4294966784 }
  0x36   :  { %839 = dma.done.wait [#allocation6], 8704  }
  0x37   :  { %840 = vsyncadd [#allocation6], 4294958592  ;;  %v74_v0 = vld [vmem:[#allocation7 + $0x80] sm:$0xff]  ;;  %v75_v1 = vld [vmem:[#allocation7 + $0x88] sm:$0xff]  ;;  %s850_s30 = smov [#allocation8]  }
  0x38   :  { %v58_v2 = vld [vmem:[#allocation7] sm:$0xff]  ;;  %v918_v3 = vpack.c.bf16 %v75_v1, %v74_v0  ;;  %v59_v4 = vld [vmem:[#allocation7 + $0x8] sm:$0xff]  ;;  %v76_v11 = vld [vmem:[#allocation7 + $0x90] sm:$0xff]  ;;  %s427_s6 = sshll.u32 %s850_s30, 4  ;;  %s428_s6 = int_to_ptr.vmem [resolvable:$true] %s427_s6 }
  0x39   :  { %v106_v5 = vld [vmem:[#allocation7 + $0x180] sm:$0xff]  ;;  %v107_v6 = vld [vmem:[#allocation7 + $0x188] sm:$0xff]  ;;  %v920_v7 = vpack.c.bf16 %v59_v4, %v58_v2  ;;  %v77_v13 = vld [vmem:[#allocation7 + $0x98] sm:$0xff]  ;;  %s793_s7 = scalar_lea.vmem %s428_s6, 128  ;;  %p798_p11 = scmp.lt.s32.totalorder %s428_s6, %s428_s6 }
  0x3a   :  { %v922_v8 = vpack.c.bf16 %v107_v6, %v106_v5  ;;  %v90_v9 = vld [vmem:[#allocation7 + $0x100] sm:$0xff]  ;;  %v91_v10 = vld [vmem:[#allocation7 + $0x108] sm:$0xff]  ;;  %593 = vmatprep.subr.bf16.mxu0 %v918_v3  ;;  %v60_v14 = vld [vmem:[#allocation7 + $0x10] sm:$0xff]  ;;  %v929_v16 = vpack.c.bf16 %v77_v13, %v76_v11  ;;  %p794_p10 = scmp.ne.s32.totalorder %s428_s6, %s793_s7  ;;  %p799_p12 = scmp.lt.s32.totalorder %s793_s7, %s793_s7 }
  0x3b   :  { %v925_v12 = vpack.c.bf16 %v91_v10, %v90_v9  ;;  %v61_v15 = vld [vmem:[#allocation7 + $0x18] sm:$0xff]  ;;  %595 = vmatpush3.bf16.msra.mxu0 %v920_v7  ;;  %v108_v18 = vld [vmem:[#allocation7 + $0x190] sm:$0xff]  ;;  %v78_v23 = vld [vmem:[#allocation7 + $0xa0] sm:$0xff] }
  0x3c   :  { %625 = vmatprep.subr.bf16.mxu1 %v922_v8  ;;  %v931_v17 = vpack.c.bf16 %v61_v15, %v60_v14  ;;  %v109_v19 = vld [vmem:[#allocation7 + $0x198] sm:$0xff]  ;;  %v92_v20 = vld [vmem:[#allocation7 + $0x110] sm:$0xff]  ;;  %v79_v24 = vld [vmem:[#allocation7 + $0xa8] sm:$0xff]  ;;  %597 = vmatprep.subr.bf16.mxu0 %v929_v16  ;;  %p800_p13 = por %p799_p12, %p798_p11 }
  0x3d   :  { %627 = vmatpush3.bf16.msra.mxu1 %v925_v12  ;;  %v934_v21 = vpack.c.bf16 %v109_v19, %v108_v18  ;;  %v93_v22 = vld [vmem:[#allocation7 + $0x118] sm:$0xff]  ;;  %v939_v26 = vpack.c.bf16 %v79_v24, %v78_v23  ;;  %v62_v27 = vld [vmem:[#allocation7 + $0x20] sm:$0xff]  ;;  %v63_v28 = vld [vmem:[#allocation7 + $0x28] sm:$0xff] }
  0x3e   :  { %v937_v25 = vpack.c.bf16 %v93_v22, %v92_v20  ;;  %v110_v29 = vld [vmem:[#allocation7 + $0x1a0] sm:$0xff]  ;;  %v111_v30 = vld [vmem:[#allocation7 + $0x1a8] sm:$0xff]  ;;  %v943_v33 = vpack.c.bf16 %v63_v28, %v62_v27  ;;  %v80_v35 = vld [vmem:[#allocation7 + $0xb0] sm:$0xff]  ;;  %p801_p0 = pnand %p800_p13, %p794_p10 }
  0x3f   :  { %629 = vmatprep.subr.bf16.mxu1 %v934_v21  ;;  %v94_v31 = vld [vmem:[#allocation7 + $0x120] sm:$0xff]  ;;  %v95_v32 = vld [vmem:[#allocation7 + $0x128] sm:$0xff]  ;;  %599 = vmatpush3.bf16.msra.mxu0 %v931_v17  ;;  %v945_v34 = vpack.c.bf16 %v111_v30, %v110_v29  ;;  %v81_v36 = vld [vmem:[#allocation7 + $0xb8] sm:$0xff] }
  0x40   :  { %v64_v37 = vld [vmem:[#allocation7 + $0x30] sm:$0xff]  ;;  %601 = vmatprep.subr.bf16.mxu0 %v939_v26  ;;  %v949_v38 = vpack.c.bf16 %v95_v32, %v94_v31  ;;  %v951_v39 = vpack.c.bf16 %v81_v36, %v80_v35  ;;  %v65_v40 = vld [vmem:[#allocation7 + $0x38] sm:$0xff]  ;;  %v82_v46 = vld [vmem:[#allocation7 + $0xc0] sm:$0xff] }
  0x41   :  { %631 = vmatpush3.bf16.msra.mxu1 %v937_v25  ;;  %v112_v41 = vld [vmem:[#allocation7 + $0x1b0] sm:$0xff]  ;;  %v113_v42 = vld [vmem:[#allocation7 + $0x1b8] sm:$0xff]  ;;  %v83_v47 = vld [vmem:[#allocation7 + $0xc8] sm:$0xff]  ;;  %v957_v48 = vpack.c.bf16 %v65_v40, %v64_v37 }
  0x42   :  { %633 = vmatprep.subr.bf16.mxu1 %v945_v34  ;;  %v954_v43 = vpack.c.bf16 %v113_v42, %v112_v41  ;;  %v96_v44 = vld [vmem:[#allocation7 + $0x130] sm:$0xff]  ;;  %v97_v45 = vld [vmem:[#allocation7 + $0x138] sm:$0xff]  ;;  %v114_v49 = vld [vmem:[#allocation7 + $0x1c0] sm:$0xff]  ;;  %v963_v52 = vpack.c.bf16 %v83_v47, %v82_v46 }
  0x43   :  { %603 = vmatpush3.bf16.msra.mxu0 %v943_v33  ;;  %v115_v50 = vld [vmem:[#allocation7 + $0x1c8] sm:$0xff]  ;;  %v961_v51 = vpack.c.bf16 %v97_v45, %v96_v44  ;;  %v66_v53 = vld [vmem:[#allocation7 + $0x40] sm:$0xff]  ;;  %v84_v58 = vld [vmem:[#allocation7 + $0xd0] sm:$0xff] }
  0x44   :  { %605 = vmatprep.subr.bf16.mxu0 %v951_v39  ;;  %v67_v54 = vld [vmem:[#allocation7 + $0x48] sm:$0xff]  ;;  %v98_v55 = vld [vmem:[#allocation7 + $0x140] sm:$0xff]  ;;  %v966_v56 = vpack.c.bf16 %v115_v50, %v114_v49  ;;  %v85_v59 = vld [vmem:[#allocation7 + $0xd8] sm:$0xff] }
  0x45   :  { %635 = vmatpush3.bf16.msra.mxu1 %v949_v38  ;;  %v99_v57 = vld [vmem:[#allocation7 + $0x148] sm:$0xff]  ;;  %v116_v60 = vld [vmem:[#allocation7 + $0x1d0] sm:$0xff]  ;;  %v117_v61 = vld [vmem:[#allocation7 + $0x1d8] sm:$0xff]  ;;  %v969_v62 = vpack.c.bf16 %v67_v54, %v66_v53  ;;  %v975_v0 = vpack.c.bf16 %v85_v59, %v84_v58 }
  0x46   :  { %637 = vmatprep.subr.bf16.mxu1 %v954_v43  ;;  %v973_v63 = vpack.c.bf16 %v99_v57, %v98_v55  ;;  %v68_v1 = vld [vmem:[#allocation7 + $0x50] sm:$0xff]  ;;  %v69_v2 = vld [vmem:[#allocation7 + $0x58] sm:$0xff]  ;;  %v978_v5 = vpack.c.bf16 %v117_v61, %v116_v60  ;;  %v86_v9 = vld [vmem:[#allocation7 + $0xe0] sm:$0xff] }
  0x47   :  { %607 = vmatpush3.bf16.msra.mxu0 %v957_v48  ;;  %v100_v4 = vld [vmem:[#allocation7 + $0x150] sm:$0xff]  ;;  %v101_v6 = vld [vmem:[#allocation7 + $0x158] sm:$0xff]  ;;  %v87_v10 = vld [vmem:[#allocation7 + $0xe8] sm:$0xff]  ;;  %v981_v14 = vpack.c.bf16 %v69_v2, %v68_v1 }
  0x48   :  { %609 = vmatprep.subr.bf16.mxu0 %v963_v52  ;;  %v118_v11 = vld [vmem:[#allocation7 + $0x1e0] sm:$0xff]  ;;  %v119_v13 = vld [vmem:[#allocation7 + $0x1e8] sm:$0xff]  ;;  %v985_v19 = vpack.c.bf16 %v101_v6, %v100_v4  ;;  %v987_v20 = vpack.c.bf16 %v87_v10, %v86_v9  ;;  %v88_v28 = vld [vmem:[#allocation7 + $0xf0] sm:$0xff] }
  0x49   :  { %639 = vmatpush3.bf16.msra.mxu1 %v961_v51  ;;  %v70_v15 = vld [vmem:[#allocation7 + $0x60] sm:$0xff]  ;;  %v71_v18 = vld [vmem:[#allocation7 + $0x68] sm:$0xff]  ;;  %v648_v27 = vpack.c.bf16 %v119_v13, %v118_v11  ;;  %v89_v29 = vld [vmem:[#allocation7 + $0xf8] sm:$0xff] }
  0x4a   :  { %641 = vmatprep.subr.bf16.mxu1 %v966_v56  ;;  %v102_v22 = vld [vmem:[#allocation7 + $0x160] sm:$0xff]  ;;  %v103_v23 = vld [vmem:[#allocation7 + $0x168] sm:$0xff]  ;;  %v126_v30 = vld [vmem:[#allocation2 + $0x18] sm:$0xff]  ;;  %v618_v35 = vpack.c.bf16 %v71_v18, %v70_v15  ;;  %v620_v37 = vpack.c.bf16 %v89_v29, %v88_v28 }
  0x4b   :  { %611 = vmatpush3.bf16.msra.mxu0 %v969_v62  ;;  %v124_v24 = vld [vmem:[#allocation2 + $0x8] sm:$0xff]  ;;  %v120_v31 = vld [vmem:[#allocation7 + $0x1f0] sm:$0xff]  ;;  %v121_v32 = vld [vmem:[#allocation7 + $0x1f8] sm:$0xff]  ;;  %267 = vmatprep.mubr.f32.mxu1 %v126_v30  ;;  %v650_v36 = vpack.c.bf16 %v103_v23, %v102_v22 }
  0x4c   :  { %613 = vmatprep.subr.bf16.mxu0 %v975_v0  ;;  %197 = vmatprep.mubr.f32.mxu0 %v124_v24  ;;  %v72_v40 = vld [vmem:[#allocation7 + $0x70] sm:$0xff]  ;;  %v73_v41 = vld [vmem:[#allocation7 + $0x78] sm:$0xff]  ;;  %v652_v42 = vpack.c.bf16 %v121_v32, %v120_v31  ;;  %v123_v49 = vld [vmem:[#allocation2] sm:$0xff] }
  0x4d   :  { %643 = vmatpush3.bf16.msra.mxu1 %v973_v63  ;;  %v104_v44 = vld [vmem:[#allocation7 + $0x170] sm:$0xff]  ;;  %v105_v45 = vld [vmem:[#allocation7 + $0x178] sm:$0xff]  ;;  %v622_v46 = vpack.c.bf16 %v73_v41, %v72_v40  ;;  %v274_v53 = vld [vmem:[#allocation5 + $0x8] sm:$0xff] }
  0x4e   :  { %645 = vmatprep.subr.bf16.mxu1 %v978_v5  ;;  %v654_v47 = vpack.c.bf16 %v105_v45, %v104_v44  ;;  %v125_v50 = vld [vmem:[#allocation2 + $0x10] sm:$0xff]  ;;  %v276_v54 = vld [vmem:[#allocation5 + $0x18] sm:$0xff] }
  0x4f   :  { %615 = vmatpush3.bf16.msra.mxu0 %v981_v14 }
  0x50   :  { %617 = vmatprep.subr.bf16.mxu0 %v987_v20 }
  0x51   :  { %647 = vmatpush3.bf16.msra.mxu1 %v985_v19 }
  0x52   :  { %649 = vmatprep.subr.bf16.mxu1 %v648_v27 }
  0x53   :  { %619 = vmatpush3.bf16.msra.mxu0 %v618_v35 }
  0x54   :  { %621 = vmatprep.subr.bf16.mxu0 %v620_v37 }
  0x55   :  { %651 = vmatpush3.bf16.msra.mxu1 %v650_v36 }
  0x56   :  { %653 = vmatprep.subr.bf16.mxu1 %v652_v42 }
  0x57   :  { %623 = vmatpush3.bf16.msra.mxu0 %v622_v46 }
  0x58   :  { %657 = vmatprep.subr.bf16.mxu0 %v918_v3  ;;  %v273_v3 = vld [vmem:[#allocation5] sm:$0xff] }
  0x59   :  { %655 = vmatpush3.bf16.msra.mxu1 %v654_v47 }
  0x5a   :  { %689 = vmatprep.subr.bf16.mxu1 %v922_v8  ;;  %198 = vmatmul.mubr.f32.vlgmr.msra.gmra.mrb[0].mxu0 %v123_v49 }
  0x5b   :  { %659 = vmatpush3.bf16.msra.mxu0 %v920_v7  ;;  %341 = vmatprep.mubr.f32.mxu0 %v274_v53  ;;  %v275_v7 = vld [vmem:[#allocation5 + $0x10] sm:$0xff] }
  0x5c   :  { %268 = vmatmul.mubr.f32.vlgmr.msra.gmra.mrb[0].mxu1 %v125_v50  ;;  %661 = vmatprep.subr.bf16.mxu0 %v929_v16 }
  0x5d   :  { %691 = vmatpush3.bf16.msra.mxu1 %v925_v12  ;;  %411 = vmatprep.mubr.f32.mxu1 %v276_v54  ;;  %v451_v12 = vld [vmem:[%s1048_s3] ss:$0 sm:$0xff] }
  0x5e   :  { %693 = vmatprep.subr.bf16.mxu1 %v934_v21 }
  0x5f   :  { %663 = vmatpush3.bf16.msra.mxu0 %v931_v17 }
  0x60   :  { %665 = vmatprep.subr.bf16.mxu0 %v939_v26 }
  0x61   :  { %695 = vmatpush3.bf16.msra.mxu1 %v937_v25 }
  0x62   :  { %697 = vmatprep.subr.bf16.mxu1 %v945_v34 }
  0x63   :  { %667 = vmatpush3.bf16.msra.mxu0 %v943_v33 }
  0x64   :  { %669 = vmatprep.subr.bf16.mxu0 %v951_v39 }
  0x65   :  { %699 = vmatpush3.bf16.msra.mxu1 %v949_v38 }
  0x66   :  { %701 = vmatprep.subr.bf16.mxu1 %v954_v43 }
  0x67   :  { %671 = vmatpush3.bf16.msra.mxu0 %v957_v48 }
  0x68   :  { %673 = vmatprep.subr.bf16.mxu0 %v963_v52 }
  0x69   :  { %703 = vmatpush3.bf16.msra.mxu1 %v961_v51 }
  0x6a   :  { %705 = vmatprep.subr.bf16.mxu1 %v966_v56 }
  0x6b   :  { %675 = vmatpush3.bf16.msra.mxu0 %v969_v62 }
  0x6c   :  { %677 = vmatprep.subr.bf16.mxu0 %v975_v0 }
  0x6d   :  { %707 = vmatpush3.bf16.msra.mxu1 %v973_v63 }
  0x6e   :  { %709 = vmatprep.subr.bf16.mxu1 %v978_v5 }
  0x6f   :  { %679 = vmatpush3.bf16.msra.mxu0 %v981_v14 }
  0x70   :  { %681 = vmatprep.subr.bf16.mxu0 %v987_v20 }
  0x71   :  { %711 = vmatpush3.bf16.msra.mxu1 %v985_v19 }
  0x72   :  { %713 = vmatprep.subr.bf16.mxu1 %v648_v27 }
  0x73   :  { %683 = vmatpush3.bf16.msra.mxu0 %v618_v35 }
  0x74   :  { %685 = vmatprep.subr.bf16.mxu0 %v620_v37 }
  0x75   :  { %715 = vmatpush3.bf16.msra.mxu1 %v650_v36 }
  0x76   :  { %717 = vmatprep.subr.bf16.mxu1 %v652_v42 }
  0x77   :  { %687 = vmatpush3.bf16.msra.mxu0 %v622_v46 }
  0x79   :  { %719 = vmatpush3.bf16.msra.mxu1 %v654_v47 }
  0x7a   :  { %342 = vmatmul.mubr.f32.vlgmr.msra.gmra.mrb[2].mxu0 %v273_v3 }
  0x7c   :  { %412 = vmatmul.mubr.f32.vlgmr.msra.gmra.mrb[2].mxu1 %v275_v7 }
 0x12d   :  { %v484_v8 = vpop.f32.mrb[0].mxu0 }
 0x12e   :  { %v485_v16 = vpop.f32.mrb[1].mxu0 }
 0x12f   :  { %v519_v17 = vpop.f32.mrb[0].mxu1  ;;  %v486_v21 = vadd.f32 %v485_v16, %v484_v8 }
 0x130   :  { %v520_v25 = vpop.f32.mrb[1].mxu1 }
 0x131   :  { %v521_v26 = vadd.f32 %v520_v25, %v519_v17  ;;  %v200_v33 = vadd.f32 %v486_v21, %v451_v12 }
 0x133   :  { %v270_v34 = vadd.f32 %v521_v26, %v200_v33 }
 0x135   :  { %v417_v38 = vmax.f32 %v270_v34, 0.0 }
 0x137   :  { %418 = vst [vmem:[#allocation8] sm:$0xff] %v417_v38 }
 0x138   :  { %804 = shalt.err (!%p801_p0)
}
 0x139   :  { %s805_s9 = scalar_lea.hbm %s1049_s4, 128 }
 0x13a   :  { %p806_p1 = scmp.ne.s32.totalorder %s1049_s4, %s805_s9  ;;  %p809_p2 = scmp.lt.u32.totalorder %s805_s9, %s1049_s4 }
 0x13c   :  { %p811_p3 = pnand %p809_p2, %p806_p1 }
 0x13e   :  { %814 = shalt.err (!%p811_p3)
}
 0x13f   :  { %430 = dma.vmem_to_hbm [thread:$0]  %s428_s6, 128, %s1049_s4, [#allocation4]  }
 0x140   :  { %s851_s15 = smov [#allocation9]  }
 0x141   :  { %s437_s16 = sshll.u32 %s851_s15, 4  ;;  %s438_s16 = int_to_ptr.vmem [resolvable:$true] %s437_s16 }
 0x142   :  { %s815_s17 = scalar_lea.vmem %s438_s16, 128  ;;  %p820_p5 = scmp.lt.s32.totalorder %s438_s16, %s438_s16 }
 0x143   :  { %p816_p4 = scmp.ne.s32.totalorder %s438_s16, %s815_s17  ;;  %p821_p6 = scmp.lt.s32.totalorder %s815_s17, %s815_s17 }
 0x145   :  { %p822_p7 = por %p821_p6, %p820_p5 }
 0x147   :  { %p823_p8 = pnand %p822_p7, %p816_p4 }
 0x14d   :  { %v554_v39 = vpop.f32.mrb[2].mxu0 }
 0x14e   :  { %v555_v43 = vpop.f32.mrb[3].mxu0 }
 0x14f   :  { %v589_v48 = vpop.f32.mrb[2].mxu1  ;;  %v556_v51 = vadd.f32 %v555_v43, %v554_v39 }
 0x150   :  { %v590_v52 = vpop.f32.mrb[3].mxu1 }
 0x151   :  { %v591_v55 = vadd.f32 %v590_v52, %v589_v48  ;;  %v344_v56 = vadd.f32 %v556_v51, %v451_v12 }
 0x153   :  { %v414_v57 = vadd.f32 %v591_v55, %v344_v56 }
 0x155   :  { %v419_v58 = vmax.f32 %v414_v57, 0.0 }
 0x157   :  { %420 = vst [vmem:[#allocation9] sm:$0xff] %v419_v58 }
 0x158   :  { %826 = shalt.err (!%p823_p8)
}
 0x159   :  { %s827_s19 = scalar_lea.hbm %s1050_s5, 128 }
 0x15a   :  { %p828_p9 = scmp.ne.s32.totalorder %s1050_s5, %s827_s19  ;;  %p831_p10 = scmp.lt.u32.totalorder %s827_s19, %s1050_s5 }
 0x15c   :  { %p833_p11 = pnand %p831_p10, %p828_p9 }
 0x15e   :  { %836 = shalt.err (!%p833_p11)
}
 0x15f   :  { %440 = dma.vmem_to_hbm [thread:$0]  %s438_s16, 128, %s1050_s5, [#allocation10]  }
 0x160   :  { %841 = dma.done.wait [#allocation4], 128  }
 0x161   :  { %842 = vsyncadd [#allocation4], 4294967168 }
 0x162   :  { %843 = dma.done.wait [#allocation10], 128  }
 0x163   :  { %844 = vsyncadd [#allocation10], 4294967168 }
 0x164   :  { %447 = vsyncpa [#allocation3], 1 }
 0x165   :  { %448 = vsyncpa [#allocation6], 1 }
 0x166   :  { %449 = vsyncpa [#allocation4], 1 }
 0x167   :  { %450 = vsyncpa [#allocation10], 1 }

</bundles_post_ra>
